<compile_context>
chip_gen: v7x
topology: tpu7x:2x2x1
jax: 0.10.0
libtpu: 0.0.40
codegen_flags: <defaults>
</compile_context>

<pallas_src>
import jax
import jax.numpy as jnp
import numpy as np
from jax.experimental import pallas as pl
from jax.experimental.pallas import tpu as pltpu

DROPOUT_P = 0.4


# ---------------------------------------------------------------------------
# Kernels
# ---------------------------------------------------------------------------
def _head_kernel_eval(x_ref, w_ref, b_ref, o_ref):
    # Eval-mode dropout == identity. Feed native dtype straight to the MXU,
    # accumulate in f32, add the f32 bias, cast once on store.
    y = jnp.dot(x_ref[...], w_ref[...], preferred_element_type=jnp.float32)
    o_ref[...] = (y + b_ref[...]).astype(o_ref.dtype)


def _head_kernel_train(seed_ref, x_ref, w_ref, b_ref, o_ref):
    # Per-tile seed: each row-tile draws an independent dropout mask.
    pltpu.prng_seed(seed_ref[0] + pl.program_id(0))
    bits = pltpu.bitcast(pltpu.prng_random_bits(x_ref.shape), jnp.uint32)
    thresh = jnp.uint32(int(DROPOUT_P * (2 ** 32)))      # drop with prob p
    keep = bits >= thresh                                # keep with prob 1-p
    x = jnp.where(keep, x_ref[...], jnp.zeros((), x_ref.dtype))
    y = jnp.dot(x, w_ref[...], preferred_element_type=jnp.float32)
    # Fold the 1/(1-p) rescale into the small [TILE_N, L] output (N*L muls
    # instead of N*H), numerically identical.
    o_ref[...] = (y * jnp.float32(1.0 / (1.0 - DROPOUT_P)) + b_ref[...]).astype(o_ref.dtype)


# ---------------------------------------------------------------------------
# Wrapper
# ---------------------------------------------------------------------------
def esm_classification_head(features, weight, bias, *, training=False, seed=0,
                            tile_n=512):
    """features: [..., hidden]; weight: [hidden, num_labels]; bias: [num_labels]."""
    orig_shape = features.shape
    H = orig_shape[-1]
    L = weight.shape[1]
    x2d = features.reshape(-1, H)
    N = x2d.shape[0]
    b2d = bias.reshape(1, L).astype(jnp.float32)

    # Row tile: sublane-aligned (multiple of 8), no bigger than needed.
    tile_n = ((tile_n + 7) // 8) * 8
    tile_n = min(tile_n, max(8, ((N + 7) // 8) * 8))
    grid = (pl.cdiv(N, tile_n),)

    out_shape = jax.ShapeDtypeStruct((N, L), features.dtype)

    x_item = jnp.dtype(features.dtype).itemsize
    w_item = jnp.dtype(weight.dtype).itemsize
    cost = pl.CostEstimate(
        flops=2 * N * H * L,
        transcendentals=0,
        bytes_accessed=N * H * x_item + H * L * w_item + N * L * x_item,
    )
    # Parallel N axis: lets Mosaic shard row tiles across v7x's 2 TensorCores.
    cparams = pltpu.CompilerParams(dimension_semantics=("parallel",))

    if training:
        seed_arr = jnp.asarray([seed], dtype=jnp.int32)
        out = pl.pallas_call(
            _head_kernel_train,
            out_shape=out_shape,
            grid_spec=pltpu.PrefetchScalarGridSpec(
                num_scalar_prefetch=1,
                grid=grid,
                in_specs=[
                    pl.BlockSpec((tile_n, H), lambda i, s_ref: (i, 0)),
                    pl.BlockSpec((H, L), lambda i, s_ref: (0, 0)),   # resident
                    pl.BlockSpec((1, L), lambda i, s_ref: (0, 0)),   # resident
                ],
                out_specs=pl.BlockSpec((tile_n, L), lambda i, s_ref: (i, 0)),
            ),
            compiler_params=cparams,
            cost_estimate=cost,
        )(seed_arr, x2d, weight, b2d)
    else:
        out = pl.pallas_call(
            _head_kernel_eval,
            out_shape=out_shape,
            grid=grid,
            in_specs=[
                pl.BlockSpec((tile_n, H), lambda i: (i, 0)),
                pl.BlockSpec((H, L), lambda i: (0, 0)),              # resident
                pl.BlockSpec((1, L), lambda i: (0, 0)),              # resident
            ],
            out_specs=pl.BlockSpec((tile_n, L), lambda i: (i, 0)),
            compiler_params=cparams,
            cost_estimate=cost,
        )(x2d, weight, b2d)

    return out.reshape(*orig_shape[:-1], L)


# ---------------------------------------------------------------------------
# Main
# ---------------------------------------------------------------------------
if __name__ == "__main__":
    # Small shapes consistent with the module: features [B, S, H], labels L.
    B, S, H, L = 2, 8, 32, 4

    key = jax.random.PRNGKey(0)
    k_feat, k_w, k_b = jax.random.split(key, 3)

    features = jax.random.normal(k_feat, (B, S, H), dtype=jnp.float32)

    # Deterministic PyTorch-nn.Linear-style init: U(-1/sqrt(H), 1/sqrt(H)).
    bound = 1.0 / np.sqrt(H)
    # Stored as [H, L] == transpose of PyTorch's [L, H] weight.
    weight = jax.random.uniform(k_w, (H, L), minval=-bound, maxval=bound,
                                dtype=jnp.float32)
    bias = jax.random.uniform(k_b, (L,), minval=-bound, maxval=bound,
                              dtype=jnp.float32)

    # Eval-mode forward (dropout == identity), matching module inference.
    # tile_n=8 forces a multi-tile grid (grid=(2,)) even at toy shapes so the
    # pipelined/tiled path is exercised; production default is 512 rows.
    out = esm_classification_head(features, weight, bias, training=False,
                                  tile_n=8)
    out = jax.block_until_ready(out)

    # Reference check in plain JAX.
    ref = features.reshape(-1, H) @ weight + bias
    ref = ref.reshape(B, S, L)
    np.testing.assert_allclose(np.asarray(out), np.asarray(ref),
                               rtol=1e-5, atol=1e-5)

    assert out.shape == (B, S, L)
    print("KERNEL_OK")
</pallas_src>

<mosaic_0001>
module attributes {stable_mosaic.version = 11 : i64} {
  func.func @_head_kernel_eval(%arg0: i32, %arg1: memref<8x32xf32, #tpu.memory_space<vmem>>, %arg2: memref<32x4xf32, #tpu.memory_space<vmem>>, %arg3: memref<1x4xf32, #tpu.memory_space<vmem>>, %arg4: memref<8x4xf32, #tpu.memory_space<vmem>>) attributes {dimension_semantics = [#tpu.dimension_semantics<parallel>], iteration_bounds = array<i64: 2>, scalar_prefetch = 0 : i64, scratch_operands = 0 : i64, tpu.core_type = #tpu.core_type<tc>, window_params = [{transform_indices = @transform_0, window_bounds = array<i64: 8, 32>}, {pipeline_mode = #tpu.pipeline_mode<synchronous>, transform_indices = @transform_1, window_bounds = array<i64: 32, 4>}, {pipeline_mode = #tpu.pipeline_mode<synchronous>, transform_indices = @transform_2, window_bounds = array<i64: 1, 4>}, {transform_indices = @transform_3, window_bounds = array<i64: 8, 4>}]} {
    %c0 = arith.constant 0 : index
    %c0_0 = arith.constant 0 : index
    %0 = vector.load %arg1[%c0, %c0_0] : memref<8x32xf32, #tpu.memory_space<vmem>>, vector<8x32xf32>
    %c0_1 = arith.constant 0 : index
    %c0_2 = arith.constant 0 : index
    %1 = vector.load %arg2[%c0_1, %c0_2] : memref<32x4xf32, #tpu.memory_space<vmem>>, vector<32x4xf32>
    %cst = arith.constant dense<0.000000e+00> : vector<8x4xf32>
    %2 = tpu.matmul %0, %1, %cst {dimension_numbers = #tpu.dot_dimension_numbers<[1], [0], [0], [1], [0, 0, 1, 1], [], []>} : vector<8x32xf32>, vector<32x4xf32>, vector<8x4xf32> -> vector<8x4xf32>
    %c0_3 = arith.constant 0 : index
    %c0_4 = arith.constant 0 : index
    %3 = vector.load %arg3[%c0_3, %c0_4] : memref<1x4xf32, #tpu.memory_space<vmem>>, vector<1x4xf32>
    %4 = vector.broadcast %3 : vector<1x4xf32> to vector<8x4xf32>
    %5 = arith.addf %2, %4 : vector<8x4xf32>
    %c0_5 = arith.constant 0 : index
    %c0_6 = arith.constant 0 : index
    %6 = vector.load %arg4[%c0_5, %c0_6] : memref<8x4xf32, #tpu.memory_space<vmem>>, vector<8x4xf32>
    tpu.vector_store %arg4[%c0_5, %c0_6], %5 {strides = array<i32>} : memref<8x4xf32, #tpu.memory_space<vmem>>, vector<8x4xf32>,
    return
  }
  func.func @transform_0(%arg0: i32) -> (i32, i32) {
    %c0_i32 = arith.constant 0 : i32
    %c0_i32_0 = arith.constant 0 : i32
    return %arg0, %c0_i32 : i32, i32
  }
  func.func @transform_1(%arg0: i32) -> (i32, i32) {
    %c0_i32 = arith.constant 0 : i32
    %c0_i32_0 = arith.constant 0 : i32
    %c0_i32_1 = arith.constant 0 : i32
    return %c0_i32, %c0_i32_0 : i32, i32
  }
  func.func @transform_2(%arg0: i32) -> (i32, i32) {
    %c0_i32 = arith.constant 0 : i32
    %c0_i32_0 = arith.constant 0 : i32
    %c0_i32_1 = arith.constant 0 : i32
    return %c0_i32, %c0_i32_0 : i32, i32
  }
  func.func @transform_3(%arg0: i32) -> (i32, i32) {
    %c0_i32 = arith.constant 0 : i32
    %c0_i32_0 = arith.constant 0 : i32
    return %arg0, %c0_i32 : i32, i32
  }
}

</mosaic_0001>

<bundles_post_ra>
// kernel: tpu_custom_call.1
= control target key start
LH: loop header
LB: loop body
LE: loop exit
PB: predicated region body
PF: predicated region fallthrough
CT: control target
= control target key end

     0   :  { %s382_s12 = smov 0   ;;  %s414_s0 = inlined_call_operand.vmem [shape: f32[16,32], index: 0, kind: input, shape index: {}]   ;;  %s415_s1 = inlined_call_operand.vmem [shape: f32[32,4], index: 1, kind: input, shape index: {}]   ;;  %s416_s2 = inlined_call_operand.vmem [shape: f32[1,4], index: 2, kind: input, shape index: {}]   ;;  %s417_s3 = inlined_call_operand.vmem [shape: f32[16,4], index: 3, kind: output, shape index: {}]  }
   0x1 LB: > { %s307_s13 = sadd.s32 4294967295, %s357_s12   ;;  %p311_p0 = scmp.ge.s32.totalorder %s357_s12, 1  ;;  %s357_s12 = sphi %s382_s12, %s13_s12  }
   0x2   : > { %p136_p1 = scmp.lt.s32.totalorder %s357_s12, 3 }
   0x4   : > { %p137_p2 = pnand %p311_p0, %p136_p1 }
   0x5   : > { %v167_v0 = vld [vmem:[%s415_s1] sm:$0xff] (!%p137_p2)  ;;  %v168_v1 = vld [vmem:[%s415_s1 + $0x8] sm:$0xff] (!%p137_p2)  ;;  %v169_v2 = vld [vmem:[%s415_s1 + $0x10] sm:$0xff] (!%p137_p2)  ;;  %v359_v3 = vmov (!%p137_p2), 0.0|0.0   ;;  %vm360_vm0 = vmmov (!%p137_p2), 0   ;;  %v361_v6 = vmov (!%p137_p2), 0.0  }
   0x6   : > { %140 = sbr.rel (%p137_p2) target bundleno = 232 (0xe8), region = 32  ;;  %334 = vmatprep.subr.bf16.mxu0 (!%p137_p2), %v359_v3  ;;  %v335_v4 = vpack.c.bf16 (!%p137_p2), %v168_v1, %v167_v0  ;;  %v170_v5 = vld [vmem:[%s415_s1 + $0x18] sm:$0xff] (!%p137_p2)  ;;  %331 = vmatprep.mubr.msk.f32.mxu0 (!%p137_p2), %vm360_vm0, %v361_v6  ;;  %p158_p3 = scmp.lt.s32.totalorder (!%p137_p2), %s307_s13, 1  ;;  %vm178_vm1 = vcmask (!%p137_p2), 261120   ;;  %v314_v9 = vld [vmem:[%s416_s2] ss:$0 sm:$0xff] (!%p137_p2) }
   0x7   : > { %v338_v7 = vpack.c.bf16 (!%p137_p2), %v170_v5, %v169_v2  ;;  %vm252_vm2 = vcmask (!%p137_p2), 31744  }
   0x8   : > { %336 = vmatpush3.bf16.msra.mxu0 (!%p137_p2), %v335_v4 }
   0x9   : > { %337 = vmatprep.subr.bf16.mxu0 (!%p137_p2), %v359_v3 }
   0xc   : > { %339 = vmatpush3.bf16.msra.mxu0 (!%p137_p2), %v338_v7 }
   0xd   : > { %s419_s13 = smov (!%p158_p3, %s307_s13), 1 }
   0xe   : > { %s312_s22 = sshll.u32 %s419_s13, 3 }
   0xf   : > { %s161_s25 = scalar_lea.vmem %s414_s0, %s312_s22  ;;  %s165_s30 = scalar_lea.vmem %s417_s3, %s312_s22 }
  0x10   : > { %v166_v8 = vld [vmem:[%s161_s25] sm:$0xff] }
  0x11   : > { %332 = vmatmul.mubr.msk.f32.vlgmr.msra.gmra.mrb[0].mxu0 %vm178_vm1, %v166_v8 }
  0xe4   : > { %v248_v10 = vpop.f32.mrb[0].mxu0 }
  0xe5   : > { %v249_v11 = vadd.f32 %v314_v9, %v248_v10  ;;  %v333_v12 = vpop.f32.mrb[1].mxu0 }
  0xe7   : > { %253 = vst.msk [vmem:[%s165_s30] sm:$0xff] %vm252_vm2, %v249_v11 }
  0xe8 PF: > { %s13_s12 = sadd.s32 1, %s357_s12  }
  0xe9   : > { %p10_p4 = scmp.ge.s32.totalorder %s13_s12, 4  }
  0xeb   :  { %12 = sbr.rel (!%p10_p4) target bundleno = 1 (0x1), region = 62 }

</bundles_post_ra>
